<compile_context>
chip_gen: v7x
topology: tpu7x:2x2x1
jax: 0.10.0
libtpu: 0.0.40
codegen_flags: <defaults>
</compile_context>

<pallas_src>
import functools

import numpy as np

import jax
import jax.numpy as jnp
from jax import lax
from jax.experimental import pallas as pl
from jax.experimental.pallas import tpu as pltpu


_REDUCE_ALIASES = {
    "sum": "sum", "add": "sum",
    "mean": "mean", "avg": "mean",
    "min": "min", "amin": "min",
    "max": "max", "amax": "max",
}


def _cdiv(a, b):
    return -(-a // b)


def _round_up(v, m):
    return _cdiv(v, m) * m


def _sublane(itemsize):
    return {4: 8, 2: 16, 1: 32}.get(itemsize, 8)


def _vmem_capacity_bytes():
    try:
        cap = getattr(pltpu.get_tpu_info(), "vmem_capacity_bytes", None)
        if cap:
            return int(cap)
    except Exception:
        pass
    return 64 << 20  # conservative default (v7x per-TC size)


def _segment_csr_kernel(indptr_ref, sblk_ref, rblk_ref, first_ref, last_ref,
                        lo_ref, hi_ref, winlo_ref,
                        bounds_ref, meta_ref, x_ref,
                        out_ref, acc_ref,
                        *, reduce, row_tile, seg_tile, seg_win, n_rows):
    """One (d_block, work_item) grid step.

    indptr_ref..winlo_ref : SMEM int32 scalar-prefetch arrays (schedule).
    bounds_ref : VMEM int32 (seg_tile, 2)  [:,0]=start, [:,1]=end (this block)
    meta_ref   : VMEM f32   (seg_tile, 2)  [:,0]=count, [:,1]=1/max(count,1)
    x_ref      : VMEM (row_tile, d_tile)   current row block
    out_ref    : VMEM (seg_tile, d_tile)   resident across this block's items
    acc_ref    : VMEM (seg_tile, d_tile)   scratch accumulator
    """
    wi = pl.program_id(1)
    row0 = rblk_ref[wi] * row_tile
    is_first = first_ref[wi] != 0
    is_last = last_ref[wi] != 0

    if reduce in ("sum", "mean"):
        @pl.when(is_first)
        def _init():
            acc_ref[...] = jnp.zeros_like(acc_ref)

        x_tile = x_ref[...]
        if n_rows % row_tile != 0:
            # Last row block is partial: zero the out-of-bounds tail so that
            # garbage rows cannot produce 0 * NaN inside the matmul.
            rids = lax.broadcasted_iota(jnp.int32, (row_tile, 1), 0) + row0
            x_tile = jnp.where(rids < n_rows, x_tile, 0)

        row_ids = lax.broadcasted_iota(jnp.int32, (seg_win, row_tile), 1) + row0

        if seg_win == seg_tile:
            starts = bounds_ref[:, 0:1]
            ends = bounds_ref[:, 1:2]
            onehot = ((row_ids >= starts) & (row_ids < ends)).astype(x_tile.dtype)
            acc_ref[...] += jnp.dot(onehot, x_tile,
                                    preferred_element_type=jnp.float32)
        else:
            win_lo = pl.multiple_of(winlo_ref[wi], 8)
            starts = bounds_ref[pl.ds(win_lo, seg_win), 0:1]
            ends = bounds_ref[pl.ds(win_lo, seg_win), 1:2]
            onehot = ((row_ids >= starts) & (row_ids < ends)).astype(x_tile.dtype)
            acc_ref[pl.ds(win_lo, seg_win), :] = (
                acc_ref[pl.ds(win_lo, seg_win), :]
                + jnp.dot(onehot, x_tile, preferred_element_type=jnp.float32))

        @pl.when(is_last)
        def _finalize():
            acc = acc_ref[...]
            if reduce == "mean":
                acc = acc * meta_ref[:, 1:2]   # exact precomputed f32 1/count
            out_ref[...] = acc.astype(out_ref.dtype)

    else:  # min / max
        if reduce == "max":
            fill = -jnp.inf
            combine, red_fn = jnp.maximum, jnp.max
        else:
            fill = jnp.inf
            combine, red_fn = jnp.minimum, jnp.min

        @pl.when(is_first)
        def _init():
            acc_ref[...] = jnp.full_like(acc_ref, fill)

        # Stay in the input dtype (bf16 stays bf16): compare/select is exact.
        x_tile = x_ref[...]
        rids = lax.broadcasted_iota(jnp.int32, (row_tile, 1), 0) + row0
        seg_base = sblk_ref[wi] * seg_tile
        fill_v = jnp.asarray(fill, dtype=acc_ref.dtype)

        def seg_body(s, carry):
            start = indptr_ref[s]
            end = indptr_ref[s + 1]

            @pl.when(end > start)
            def _():
                mask = (rids >= start) & (rids < end)        # (row_tile, 1)
                masked = jnp.where(mask, x_tile, fill_v)     # OOB rows -> fill
                red = red_fn(masked, axis=0, keepdims=True)  # (1, d_tile)
                sl = s - seg_base
                acc_ref[pl.ds(sl, 1), :] = combine(acc_ref[pl.ds(sl, 1), :], red)

            return carry

        # Only the segments of this block intersecting this row block.
        lax.fori_loop(lo_ref[wi], hi_ref[wi], seg_body, 0)

        @pl.when(is_last)
        def _finalize():
            nonempty = meta_ref[:, 0:1] > 0.0
            out_ref[...] = jnp.where(nonempty, acc_ref[...], 0.0).astype(out_ref.dtype)


def _build_schedule(indptr_np, n_seg, seg_tile, row_tile):
    """Host-side work schedule: one item per intersecting (seg block, row block)."""
    n_seg_blocks = _cdiv(n_seg, seg_tile)
    seg_blk, row_blk, first, last, lo_g, hi_g, win_lo = [], [], [], [], [], [], []
    max_span = 1
    for sb in range(n_seg_blocks):
        s0 = sb * seg_tile
        s1 = min(s0 + seg_tile, n_seg)
        r_start = int(indptr_np[s0])
        r_end = int(indptr_np[s1])
        if r_end > r_start:
            rb_lo = r_start // row_tile
            rb_hi = (r_end - 1) // row_tile + 1
        else:
            rb_lo, rb_hi = 0, 1                 # fully-empty block: one dummy item
        for rb in range(rb_lo, rb_hi):
            r0, r1 = rb * row_tile, (rb + 1) * row_tile
            g_lo = int(np.searchsorted(indptr_np[1:], r0, side="right"))
            g_hi = int(np.searchsorted(indptr_np[:-1], r1, side="left"))
            lo, hi = max(g_lo, s0), min(g_hi, s1)
            if hi <= lo:
                lo = hi = s0
            wl = ((lo - s0) // 8) * 8
            seg_blk.append(sb)
            row_blk.append(rb)
            first.append(1 if rb == rb_lo else 0)
            last.append(0)
            lo_g.append(lo)
            hi_g.append(hi)
            win_lo.append(wl)
            max_span = max(max_span, (hi - s0) - wl)
        last[-1] = 1
    seg_win = min(seg_tile, _round_up(max_span, 8))
    win_lo = [min(w, seg_tile - seg_win) for w in win_lo]
    sched = tuple(np.asarray(a, np.int32)
                  for a in (seg_blk, row_blk, first, last, lo_g, hi_g, win_lo))
    return sched, seg_win, n_seg_blocks


# ---- index maps (exact arity: 2 grid dims + 8 scalar-prefetch refs) ---------
def _x_map(di, wi, ip, sb, rb, fi, la, lo, hi, wl):
    return (rb[wi], di)


def _seg_map(di, wi, ip, sb, rb, fi, la, lo, hi, wl):
    return (sb[wi], 0)


def _out_map(di, wi, ip, sb, rb, fi, la, lo, hi, wl):
    return (sb[wi], di)


def segment_csr(x, indptr, reduce="sum"):
    """JAX wrapper mirroring SegmentCSR.forward(x).

    `indptr` is the module's fixed parameter, so it is treated as host-known
    (numpy) and turned into a scalar-prefetched work schedule.
    """
    reduce = _REDUCE_ALIASES[reduce]
    indptr_np = np.asarray(indptr).astype(np.int64).reshape(-1)
    n_seg = int(indptr_np.shape[0]) - 1

    squeeze = (x.ndim == 1)
    if squeeze:
        x = x[:, None]
    n, d = x.shape
    indptr_np = np.clip(indptr_np, 0, n)

    orig_dtype = x.dtype
    if not jnp.issubdtype(x.dtype, jnp.floating):
        # TODO(synk): exact integer reductions (v7x MXU has no int path); f32 compute.
        x = x.astype(jnp.float32)

    if n_seg <= 0 or d == 0:
        out = jnp.zeros((max(n_seg, 0), d), orig_dtype)
        return out[:, 0] if squeeze else out
    if n == 0:
        out = jnp.zeros((n_seg, d), orig_dtype)
        return out[:, 0] if squeeze else out

    itemsize = jnp.dtype(x.dtype).itemsize
    sub = _sublane(itemsize)

    # ---- tile selection ------------------------------------------------------
    if d <= 128:
        d_tile = d                       # single lane block equal to full dim
    elif d <= 256:
        d_tile = 128                     # >=2 parallel D blocks for v7x megacore
    elif d <= 1024:
        d_tile = 256
    else:
        d_tile = 512
    n_d_blocks = _cdiv(d, d_tile)
    out_d = n_d_blocks * d_tile

    avg_len = n / max(n_seg, 1)
    base_rows = 256 if (reduce in ("min", "max") and avg_len < 64) else 1024
    max_rows_by_vmem = max(sub, (4 << 20) // max(1, 2 * d_tile * itemsize))
    row_tile = min(base_rows, max_rows_by_vmem, _round_up(n, sub))
    row_tile = max(sub, (row_tile // sub) * sub)

    seg_tile = _round_up(min(512, n_seg), sub)
    sched, seg_win, n_seg_blocks = _build_schedule(indptr_np, n_seg, seg_tile, row_tile)
    s_pad = n_seg_blocks * seg_tile
    n_work = int(sched[0].shape[0])

    # ---- small per-segment side tables (host-built, tiny) -------------------
    starts = indptr_np[:-1]
    ends = indptr_np[1:]
    bounds_np = np.zeros((s_pad, 2), np.int32)
    bounds_np[:n_seg, 0] = starts
    bounds_np[:n_seg, 1] = ends
    counts = (ends - starts).astype(np.float32)
    meta_np = np.zeros((s_pad, 2), np.float32)
    meta_np[:n_seg, 0] = counts
    meta_np[:n_seg, 1] = 1.0 / np.maximum(counts, 1.0)

    acc_dtype = jnp.float32 if reduce in ("sum", "mean") else x.dtype

    # ---- VMEM budget (includes one-hot / masked temporaries) ----------------
    acc_bytes = seg_tile * d_tile * jnp.dtype(acc_dtype).itemsize
    x_bytes = 2 * row_tile * d_tile * itemsize            # x double buffer
    out_bytes = 2 * seg_tile * d_tile * itemsize          # out double buffer
    side_bytes = 2 * 2 * seg_tile * 2 * 4                 # bounds + meta buffers
    if reduce in ("sum", "mean"):
        tmp_bytes = seg_win * row_tile * (4 + itemsize) + row_tile * d_tile * itemsize
    else:
        tmp_bytes = 2 * row_tile * d_tile * itemsize
    need = acc_bytes + x_bytes + out_bytes + side_bytes + tmp_bytes + (8 << 20)
    vmem_limit = int(min(max(need, 32 << 20), _vmem_capacity_bytes() * 4 // 5))

    kernel = functools.partial(
        _segment_csr_kernel, reduce=reduce, row_tile=row_tile,
        seg_tile=seg_tile, seg_win=seg_win, n_rows=n)

    out_pad = pl.pallas_call(
        kernel,
        out_shape=jax.ShapeDtypeStruct((s_pad, out_d), x.dtype),
        grid_spec=pltpu.PrefetchScalarGridSpec(
            num_scalar_prefetch=8,                          # indptr + schedule -> SMEM
            grid=(n_d_blocks, n_work),
            in_specs=[
                pl.BlockSpec((seg_tile, 2), _seg_map),      # bounds
                pl.BlockSpec((seg_tile, 2), _seg_map),      # meta
                pl.BlockSpec((row_tile, d_tile), _x_map),   # x (no wrapper pad)
            ],
            out_specs=pl.BlockSpec((seg_tile, d_tile), _out_map),
            scratch_shapes=[pltpu.VMEM((seg_tile, d_tile), acc_dtype)],
        ),
        compiler_params=pltpu.CompilerParams(
            dimension_semantics=("parallel", "arbitrary"),
            vmem_limit_bytes=vmem_limit,
        ),
    )(
        jnp.asarray(indptr_np, jnp.int32),
        *(jnp.asarray(a) for a in sched),
        jnp.asarray(bounds_np),
        jnp.asarray(meta_np),
        x,
    )

    out = out_pad[:n_seg, :d].astype(orig_dtype)
    return out[:, 0] if squeeze else out


def _reference_segment_csr(x, indptr, reduce):
    """Host numpy reference for correctness checking (empty segments -> 0)."""
    xh = np.asarray(x)
    ip = np.asarray(indptr).astype(np.int64)
    s = len(ip) - 1
    out = np.zeros((s, xh.shape[1]), xh.dtype)
    for i in range(s):
        seg = xh[ip[i]:ip[i + 1]]
        if seg.shape[0] == 0:
            continue
        if reduce == "sum":
            out[i] = seg.sum(0)
        elif reduce == "mean":
            out[i] = seg.mean(0)
        elif reduce == "max":
            out[i] = seg.max(0)
        else:
            out[i] = seg.min(0)
    return out


if __name__ == "__main__":
    key = jax.random.PRNGKey(0)
    k1, k2 = jax.random.split(key)

    # ---- primary module-sized example (counts -> indptr Parameter) ----------
    counts = [3, 0, 5, 8]                            # len(module) == 4
    indptr = np.concatenate([[0], np.cumsum(counts)]).astype(np.int32)  # (5,)
    N = int(indptr[-1])                              # 16 rows
    D = 32                                           # feature dim
    x = jax.random.normal(k1, (N, D), dtype=jnp.float32)

    out = segment_csr(x, indptr, reduce="sum")
    out = jax.block_until_ready(out)
    assert out.shape == (len(counts), D)

    for reduce in ("sum", "mean", "max", "min"):
        got = jax.block_until_ready(segment_csr(x, indptr, reduce=reduce))
        ref = _reference_segment_csr(x, indptr, reduce)
        assert got.shape == ref.shape
        assert np.allclose(np.asarray(got), ref, atol=1e-5, rtol=1e-5), \
            f"mismatch for reduce={reduce}"

    # ---- larger check: exercises segment windows, multiple segment blocks,
    #      multiple / partial row blocks and >1 parallel D block --------------
    rng = np.random.default_rng(0)
    lengths = rng.integers(0, 17, size=1200)         # includes empty segments
    indptr2 = np.concatenate([[0], np.cumsum(lengths)]).astype(np.int32)
    N2, D2 = int(indptr2[-1]), 160
    x2 = jax.random.normal(k2, (N2, D2), dtype=jnp.float32)
    for reduce in ("sum", "mean", "max", "min"):
        got = jax.block_until_ready(segment_csr(x2, indptr2, reduce=reduce))
        ref = _reference_segment_csr(x2, indptr2, reduce)
        assert got.shape == ref.shape
        assert np.allclose(np.asarray(got), ref, atol=1e-4, rtol=1e-4), \
            f"mismatch (large) for reduce={reduce}"

    print("KERNEL_OK")
</pallas_src>

<mosaic_0001>
module attributes {stable_mosaic.version = 11 : i64} {
  func.func @_segment_csr_kernel(%arg0: i32, %arg1: i32, %arg2: memref<5xi32, #tpu.memory_space<smem>>, %arg3: memref<1xi32, #tpu.memory_space<smem>>, %arg4: memref<1xi32, #tpu.memory_space<smem>>, %arg5: memref<1xi32, #tpu.memory_space<smem>>, %arg6: memref<1xi32, #tpu.memory_space<smem>>, %arg7: memref<1xi32, #tpu.memory_space<smem>>, %arg8: memref<1xi32, #tpu.memory_space<smem>>, %arg9: memref<1xi32, #tpu.memory_space<smem>>, %arg10: memref<8x2xi32, #tpu.memory_space<vmem>>, %arg11: memref<8x2xf32, #tpu.memory_space<vmem>>, %arg12: memref<16x32xf32, #tpu.memory_space<vmem>>, %arg13: memref<8x32xf32, #tpu.memory_space<vmem>>, %arg14: memref<8x32xf32, #tpu.memory_space<vmem>>) attributes {dimension_semantics = [#tpu.dimension_semantics<parallel>, #tpu.dimension_semantics<arbitrary>], iteration_bounds = array<i64: 1, 1>, scalar_prefetch = 8 : i64, scratch_operands = 1 : i64, tpu.core_type = #tpu.core_type<tc>, window_params = [{transform_indices = @transform_0, window_bounds = array<i64: 8, 2>}, {transform_indices = @transform_1, window_bounds = array<i64: 8, 2>}, {transform_indices = @transform_2, window_bounds = array<i64: 16, 32>}, {transform_indices = @transform_3, window_bounds = array<i64: 8, 32>}]} {
    %0 = arith.index_cast %arg1 : i32 to index
    %1 = memref.load %arg4[%0] : memref<1xi32, #tpu.memory_space<smem>>
    %c16_i32 = arith.constant 16 : i32
    %2 = arith.muli %1, %c16_i32 : i32
    %3 = arith.index_cast %arg1 : i32 to index
    %4 = memref.load %arg5[%3] : memref<1xi32, #tpu.memory_space<smem>>
    %c0_i32 = arith.constant 0 : i32
    %5 = arith.cmpi ne, %4, %c0_i32 : i32
    %6 = arith.index_cast %arg1 : i32 to index
    %7 = memref.load %arg6[%6] : memref<1xi32, #tpu.memory_space<smem>>
    %c0_i32_0 = arith.constant 0 : i32
    %8 = arith.cmpi ne, %7, %c0_i32_0 : i32
    %9 = arith.extui %5 : i1 to i32
    %c0_i32_1 = arith.constant 0 : i32
    %10 = arith.cmpi ne, %9, %c0_i32_1 : i32
    scf.if %10 {
      %cst_11 = arith.constant 0.000000e+00 : f32
      %30 = vector.broadcast %cst_11 : f32 to vector<8x32xf32>
      %c0_12 = arith.constant 0 : index
      %c0_13 = arith.constant 0 : index
      %31 = vector.load %arg14[%c0_12, %c0_13] : memref<8x32xf32, #tpu.memory_space<vmem>>, vector<8x32xf32>
      tpu.vector_store %arg14[%c0_12, %c0_13], %30 {strides = array<i32>} : memref<8x32xf32, #tpu.memory_space<vmem>>, vector<8x32xf32>,
    } else {
    }
    %c0 = arith.constant 0 : index
    %c0_2 = arith.constant 0 : index
    %11 = vector.load %arg12[%c0, %c0_2] : memref<16x32xf32, #tpu.memory_space<vmem>>, vector<16x32xf32>
    %12 = tpu.iota {dimensions = array<i32: 1>} : vector<8x16xi32>
    %13 = vector.broadcast %2 : i32 to vector<8x16xi32>
    %14 = arith.addi %12, %13 : vector<8x16xi32>
    %c0_3 = arith.constant 0 : index
    %c0_4 = arith.constant 0 : index
    %15 = vector.load %arg10[%c0_3, %c0_4] : memref<8x2xi32, #tpu.memory_space<vmem>>, vector<8x1xi32>
    %c0_5 = arith.constant 0 : index
    %c1 = arith.constant 1 : index
    %16 = vector.load %arg10[%c0_5, %c1] : memref<8x2xi32, #tpu.memory_space<vmem>>, vector<8x1xi32>
    %17 = vector.broadcast %15 : vector<8x1xi32> to vector<8x16xi32>
    %18 = arith.cmpi sge, %14, %17 : vector<8x16xi32>
    %19 = vector.broadcast %16 : vector<8x1xi32> to vector<8x16xi32>
    %20 = arith.cmpi slt, %14, %19 : vector<8x16xi32>
    %21 = arith.andi %18, %20 : vector<8x16xi1>
    %22 = arith.extui %21 : vector<8x16xi1> to vector<8x16xi32>
    %23 = arith.sitofp %22 : vector<8x16xi32> to vector<8x16xf32>
    %c0_6 = arith.constant 0 : index
    %c0_7 = arith.constant 0 : index
    %24 = vector.load %arg14[%c0_6, %c0_7] : memref<8x32xf32, #tpu.memory_space<vmem>>, vector<8x32xf32>
    %cst = arith.constant dense<0.000000e+00> : vector<8x32xf32>
    %25 = tpu.matmul %23, %11, %cst {dimension_numbers = #tpu.dot_dimension_numbers<[1], [0], [0], [1], [0, 0, 1, 1], [], []>} : vector<8x16xf32>, vector<16x32xf32>, vector<8x32xf32> -> vector<8x32xf32>
    %26 = arith.addf %24, %25 : vector<8x32xf32>
    %c0_8 = arith.constant 0 : index
    %c0_9 = arith.constant 0 : index
    %27 = vector.load %arg14[%c0_8, %c0_9] : memref<8x32xf32, #tpu.memory_space<vmem>>, vector<8x32xf32>
    tpu.vector_store %arg14[%c0_8, %c0_9], %26 {strides = array<i32>} : memref<8x32xf32, #tpu.memory_space<vmem>>, vector<8x32xf32>,
    %28 = arith.extui %8 : i1 to i32
    %c0_i32_10 = arith.constant 0 : i32
    %29 = arith.cmpi ne, %28, %c0_i32_10 : i32
    scf.if %29 {
      %c0_11 = arith.constant 0 : index
      %c0_12 = arith.constant 0 : index
      %30 = vector.load %arg14[%c0_11, %c0_12] : memref<8x32xf32, #tpu.memory_space<vmem>>, vector<8x32xf32>
      %c0_13 = arith.constant 0 : index
      %c0_14 = arith.constant 0 : index
      %31 = vector.load %arg13[%c0_13, %c0_14] : memref<8x32xf32, #tpu.memory_space<vmem>>, vector<8x32xf32>
      tpu.vector_store %arg13[%c0_13, %c0_14], %30 {strides = array<i32>} : memref<8x32xf32, #tpu.memory_space<vmem>>, vector<8x32xf32>,
    } else {
    }
    return
  }
  func.func @transform_0(%arg0: i32, %arg1: i32, %arg2: memref<5xi32, #tpu.memory_space<smem>>, %arg3: memref<1xi32, #tpu.memory_space<smem>>, %arg4: memref<1xi32, #tpu.memory_space<smem>>, %arg5: memref<1xi32, #tpu.memory_space<smem>>, %arg6: memref<1xi32, #tpu.memory_space<smem>>, %arg7: memref<1xi32, #tpu.memory_space<smem>>, %arg8: memref<1xi32, #tpu.memory_space<smem>>, %arg9: memref<1xi32, #tpu.memory_space<smem>>) -> (i32, i32) {
    %0 = arith.index_cast %arg1 : i32 to index
    %1 = memref.load %arg3[%0] : memref<1xi32, #tpu.memory_space<smem>>
    %c0_i32 = arith.constant 0 : i32
    %c0_i32_0 = arith.constant 0 : i32
    return %1, %c0_i32 : i32, i32
  }
  func.func @transform_1(%arg0: i32, %arg1: i32, %arg2: memref<5xi32, #tpu.memory_space<smem>>, %arg3: memref<1xi32, #tpu.memory_space<smem>>, %arg4: memref<1xi32, #tpu.memory_space<smem>>, %arg5: memref<1xi32, #tpu.memory_space<smem>>, %arg6: memref<1xi32, #tpu.memory_space<smem>>, %arg7: memref<1xi32, #tpu.memory_space<smem>>, %arg8: memref<1xi32, #tpu.memory_space<smem>>, %arg9: memref<1xi32, #tpu.memory_space<smem>>) -> (i32, i32) {
    %0 = arith.index_cast %arg1 : i32 to index
    %1 = memref.load %arg3[%0] : memref<1xi32, #tpu.memory_space<smem>>
    %c0_i32 = arith.constant 0 : i32
    %c0_i32_0 = arith.constant 0 : i32
    return %1, %c0_i32 : i32, i32
  }
  func.func @transform_2(%arg0: i32, %arg1: i32, %arg2: memref<5xi32, #tpu.memory_space<smem>>, %arg3: memref<1xi32, #tpu.memory_space<smem>>, %arg4: memref<1xi32, #tpu.memory_space<smem>>, %arg5: memref<1xi32, #tpu.memory_space<smem>>, %arg6: memref<1xi32, #tpu.memory_space<smem>>, %arg7: memref<1xi32, #tpu.memory_space<smem>>, %arg8: memref<1xi32, #tpu.memory_space<smem>>, %arg9: memref<1xi32, #tpu.memory_space<smem>>) -> (i32, i32) {
    %0 = arith.index_cast %arg1 : i32 to index
    %1 = memref.load %arg4[%0] : memref<1xi32, #tpu.memory_space<smem>>
    %c0_i32 = arith.constant 0 : i32
    return %1, %arg0 : i32, i32
  }
  func.func @transform_3(%arg0: i32, %arg1: i32, %arg2: memref<5xi32, #tpu.memory_space<smem>>, %arg3: memref<1xi32, #tpu.memory_space<smem>>, %arg4: memref<1xi32, #tpu.memory_space<smem>>, %arg5: memref<1xi32, #tpu.memory_space<smem>>, %arg6: memref<1xi32, #tpu.memory_space<smem>>, %arg7: memref<1xi32, #tpu.memory_space<smem>>, %arg8: memref<1xi32, #tpu.memory_space<smem>>, %arg9: memref<1xi32, #tpu.memory_space<smem>>) -> (i32, i32) {
    %0 = arith.index_cast %arg1 : i32 to index
    %1 = memref.load %arg3[%0] : memref<1xi32, #tpu.memory_space<smem>>
    %c0_i32 = arith.constant 0 : i32
    return %1, %arg0 : i32, i32
  }
}

</mosaic_0001>

<bundles_post_ra>
// kernel: tpu_custom_call.1
= control target key start
LH: loop header
LB: loop body
LE: loop exit
PB: predicated region body
PF: predicated region fallthrough
CT: control target
= control target key end

     0   :  { %s419_s0 = inlined_call_operand.vmem [shape: s32[5], index: 0, kind: input, shape index: {}]   ;;  %s420_s1 = inlined_call_operand.<no memory space> [shape: s32[1], index: 1, kind: input, shape index: {}]   ;;  %s421_s2 = inlined_call_operand.<no memory space> [shape: s32[1], index: 2, kind: input, shape index: {}]   ;;  %s422_s3 = inlined_call_operand.<no memory space> [shape: s32[1], index: 3, kind: input, shape index: {}]   ;;  %s423_s4 = inlined_call_operand.<no memory space> [shape: s32[1], index: 4, kind: input, shape index: {}]   ;;  %s424_s5 = inlined_call_operand.<no memory space> [shape: s32[1], index: 5, kind: input, shape index: {}]   ;;  %s425_s6 = inlined_call_operand.<no memory space> [shape: s32[1], index: 6, kind: input, shape index: {}]   ;;  %s426_s7 = inlined_call_operand.<no memory space> [shape: s32[1], index: 7, kind: input, shape index: {}]   ;;  %s427_s8 = inlined_call_operand.vmem [shape: s32[8,2], index: 8, kind: input, shape index: {}]   ;;  %s428_s9 = inlined_call_operand.vmem [shape: f32[8,2], index: 9, kind: input, shape index: {}]   ;;  %s429_s10 = inlined_call_operand.vmem [shape: f32[16,32], index: 10, kind: input, shape index: {}]   ;;  %s430_s11 = inlined_call_operand.hbm [shape: f32[8,32], index: 11, kind: output, shape index: {}]  }
   0x1   :  { %s16_s18 = sshll.u32 %s419_s0, 4  ;;  %20 = sst [smem:[#allocation5]] %s420_s1  ;;  %s17_s18 = int_to_ptr.vmem [resolvable:$true] %s16_s18 }
   0x2   :  { %s274_s7 = scalar_lea.vmem %s17_s18, 16  ;;  %p279_p1 = scmp.lt.s32.totalorder %s17_s18, %s17_s18 }
   0x3   :  { %p275_p0 = scmp.ne.s32.totalorder %s17_s18, %s274_s7  ;;  %p280_p2 = scmp.lt.s32.totalorder %s274_s7, %s274_s7 }
   0x5   :  { %p281_p3 = por %p280_p2, %p279_p1 }
   0x7   :  { %p282_p4 = pnand %p281_p3, %p275_p0 }
   0x9   :  { %285 = shalt.err (!%p282_p4)  }
   0xa   :  { %s314_s9 = smov [#allocation4]  }
   0xb   :  { %19 = dma.vmem_to_smem %s17_s18, 16, %s314_s9, [#allocation3] }
   0xc   :  { %310 = dma.done.wait [#allocation3], 16 }
   0xd   :  { %311 = vsyncadd [#allocation3], 4294967280 }
   0xe   :  { %28 = sfence }
   0xf   :  { %29 = vsyncpa [#allocation13], 0  ;;  %s72_s20 = sld [smem:[#allocation5]]  ;;  %s243_s22 = sshll.u32 %s421_s2, 1 }
  0x10   :  { %p86_p5 = scmp.lt.s32.totalorder %s243_s22, 1  ;;  %s245_s24 = sshll.u32 %s421_s2, 4 }
  0x11   :  { %p246_p7 = scmp.eq.s32.totalorder %s422_s3, 0 }
  0x12   :  { %s432_s22 = smov (!%p86_p5, %s243_s22), 1  ;;  %vm102_vm0 = vcmask (!%p246_p7), 261120   ;;  %v315_v0 = vmov (!%p246_p7), 0.0  }
  0x13   :  { %s244_s25 = sshll.u32 %s432_s22, 3  ;;  %101 = sbr.rel (%p246_p7) target bundleno = 26 (0x1a), region = 17  ;;  %103 = vst.msk [vmem:[#allocation2] sm:$0xff] (!%p246_p7), %vm102_vm0, %v315_v0 }
  0x14   :  { %s89_s28 = scalar_lea.vmem %s429_s10, %s244_s25 }
  0x15   :  { %p73_p6 = scmp.lt.s32.totalorder %s72_s20, 0 }
  0x17   :  { %s434_s20 = smov (!%p73_p6, %s72_s20), 0 }
  0x18   :  { %s242_s29 = sshll.u32 %s434_s20, 3 }
  0x19   :  { %s76_s13 = scalar_lea.vmem %s427_s8, %s242_s29 }
  0x1a PF:  { %v110_v1 = vld [vmem:[%s76_s13] sm:$0xff]  ;;  %v316_v2 = vmov 0   ;;  %v317_v3 = vmov 0.0|0.0   ;;  %v105_v5 = vld [vmem:[%s89_s28 + $0x8] sm:$0xff]  ;;  %v318_v7 = vmov 1   ;;  %vm319_vm1 = vmmov 0  }
  0x1b   :  { %272 = vset.pattern.permute.xlu0 %v316_v2  ;;  %261 = vmatprep.subr.bf16.mxu0 %v317_v3  ;;  %v104_v4 = vld [vmem:[%s89_s28] sm:$0xff]  ;;  %v320_v8 = vmov 0.0   ;;  %v106_v9 = vlaneseq  ;;  %v108_v11 = vstv %s245_s24  ;;  %vm123_vm4 = vcmask 130048   ;;  %p249_p8 = scmp.eq.s32.totalorder %s423_s4, 0 }
  0x1c   :  { %112 = vperm.xlu0 %272, %v110_v1   ;;  %v262_v6 = vpack.c.bf16 %v105_v5, %v104_v4  ;;  %258 = vmatprep.mubr.msk.f32.mxu0 %vm319_vm1, %v320_v8  ;;  %v122_v16 = vld [vmem:[#allocation2] sm:$0xff]  ;;  %vm198_vm6 = vcmask 261120  }
  0x1d   :  { %v107_v10 = vand.u32 127, %v106_v9 }
  0x1e   :  { %263 = vmatpush3.bf16.msra.mxu0 %v262_v6 }
  0x1f   :  { %v109_v13 = vadd.s32 %v108_v11, %v107_v10 }
  0x20   :  { %273 = vset.pattern.permute.xlu0 %v318_v7 }
  0x21   :  { %116 = vperm.xlu0 %273, %v110_v1  }
  0x9b   :  { %v113_v12 = vpop.permute.xlu0 %112 }
  0x9c   :  { %vm114_vm2 = vcmp.ge.s32.totalorder %v109_v13, %v113_v12 }
  0xa0   :  { %v117_v14 = vpop.permute.xlu0 %116 }
  0xa1   :  { %vm118_vm3 = vcmp.lt.s32.totalorder %v109_v13, %v117_v14 }
  0xa2   :  { %vm119_vm5 = vmand %vm114_vm2, %vm118_vm3 }
  0xa3   :  { %v247_v15 = vsel %vm119_vm5, 1.0, %v320_v8 }
  0xa4   :  { %259 = vmatmul.mubr.msk.f32.vlgmr.msra.gmra.mrb[0].mxu0 %vm123_vm4, %v247_v15 }
 0x174   :  { %202 = sbr.rel (%p249_p8) target bundleno = 387 (0x183), region = 21 }
 0x177   :  { %v193_v17 = vpop.f32.mrb[0].mxu0 }
 0x178   :  { %v197_v18 = vadd.f32 %v193_v17, %v122_v16  ;;  %v260_v19 = vpop.f32.mrb[1].mxu0 }
 0x17a   :  { %199 = vst.msk [vmem:[#allocation2] sm:$0xff] %vm198_vm6, %v197_v18 }
 0x181   :  { %v203_v20 = vld [vmem:[#allocation2] sm:$0xff] }
 0x182   :  { %204 = vst.msk [vmem:[#allocation12] sm:$0xff] %vm198_vm6, %v203_v20 }
 0x183 PF:  { %s207_s2 = sld [smem:[#allocation5]]  ;;  %s321_s17 = smov [#allocation12]  }
 0x184   :  { %s214_s5 = sshll.u32 %s321_s17, 4  ;;  %s215_s5 = int_to_ptr.vmem [resolvable:$true] %s214_s5 }
 0x185   :  { %s286_s9 = scalar_lea.vmem %s215_s5, 128  ;;  %p291_p10 = scmp.lt.s32.totalorder %s215_s5, %s215_s5 }
 0x186   :  { %p287_p9 = scmp.ne.s32.totalorder %s215_s5, %s286_s9  ;;  %p292_p11 = scmp.lt.s32.totalorder %s286_s9, %s286_s9 }
 0x188   :  { %p293_p12 = por %p292_p11, %p291_p10 }
 0x189   :  { %s250_s18 = sshll.u32 %s207_s2, 7 }
 0x18a   :  { %s212_s7 = scalar_lea.hbm %s430_s11, %s250_s18  ;;  %p294_p13 = pnand %p293_p12, %p287_p9 }
 0x18c   :  { %297 = shalt.err (!%p294_p13)
}
 0x18d   :  { %s298_s4 = scalar_lea.hbm %s212_s7, 128  ;;  %s300_s21 = scalar_lea.hbm %s430_s11, 128 }
 0x18e   :  { %p299_p0 = scmp.ne.s32.totalorder %s212_s7, %s298_s4  ;;  %p301_p1 = scmp.lt.u32.totalorder %s212_s7, %s430_s11 }
 0x18f   :  { %p302_p2 = scmp.lt.u32.totalorder %s300_s21, %s298_s4  ;;  %p304_p4 = scmp.lt.u32.totalorder %s298_s4, %s212_s7 }
 0x191   :  { %p303_p3 = por %p302_p2, %p301_p1 }
 0x193   :  { %p305_p5 = por %p304_p4, %p303_p3 }
 0x195   :  { %p306_p6 = pnand %p305_p5, %p299_p0 }
 0x197   :  { %309 = shalt.err (!%p306_p6)
}
 0x198   :  { %217 = dma.vmem_to_hbm [thread:$0]  %s215_s5, 128, %s212_s7, [#allocation13]  }
 0x199   :  { %312 = dma.done.wait [#allocation13], 128  }
 0x19a   :  { %313 = vsyncadd [#allocation13], 4294967168 }
 0x19b   :  { %221 = vsyncpa [#allocation13], 1 }

</bundles_post_ra>
